<compile_context>
chip_gen: v7x
topology: tpu7x:2x2x1
jax: 0.10.0
libtpu: 0.0.40
codegen_flags: <defaults>
</compile_context>

<pallas_src>
import numpy as np
import jax
import jax.numpy as jnp
from jax.experimental import pallas as pl
from jax.experimental.pallas import tpu as pltpu

_VMEM_LIMIT = 48 * 1024 * 1024  # below v7x's 64 MiB physical, above the 16/32 MiB scoped defaults


# ----------------------------------------------------------------------------
# Kernel 1: bidirectional GRU (time-major inside the kernel), gridded over batch tiles.
#   x_ref: (T, Nt, In); outputs out_f/out_b: (T, Nt, H); scratches hold the precomputed
#   input projections for all timesteps.
# ----------------------------------------------------------------------------
def _bigru_kernel(x_ref, wih_f_ref, whh_f_ref, bih_f_ref, bhh_f_ref,
                  wih_b_ref, whh_b_ref, bih_b_ref, bhh_b_ref,
                  out_f_ref, out_b_ref, gif_ref, gib_ref):
    T, Nt, In = x_ref.shape
    H = whh_f_ref.shape[0]

    # Hoisted input projection: one big MXU matmul per direction over all T*Nt rows.
    x2 = x_ref[...].reshape(T * Nt, In)
    gif_ref[...] = (jnp.dot(x2, wih_f_ref[...], preferred_element_type=jnp.float32)
                    + bih_f_ref[...]).reshape(T, Nt, 3 * H)
    gib_ref[...] = (jnp.dot(x2, wih_b_ref[...], preferred_element_type=jnp.float32)
                    + bih_b_ref[...]).reshape(T, Nt, 3 * H)

    whh_f = whh_f_ref[...]
    whh_b = whh_b_ref[...]
    bhh_f = bhh_f_ref[...]
    bhh_b = bhh_b_ref[...]

    def gru_update(gi, gh, h_prev):
        # PyTorch GRU gate order: [r | z | n]
        r = jax.nn.sigmoid(gi[:, 0:H] + gh[:, 0:H])
        z = jax.nn.sigmoid(gi[:, H:2 * H] + gh[:, H:2 * H])
        n = jnp.tanh(gi[:, 2 * H:3 * H] + r * gh[:, 2 * H:3 * H])
        return (1.0 - z) * n + z * h_prev

    h0 = jnp.zeros((Nt, H), jnp.float32)

    # Fused forward/backward recurrence: step t (fwd) and T-1-t (bwd) in the same iteration.
    def body(i, carry):
        h_f, h_b = carry
        tb = T - 1 - i
        gh_f = jnp.dot(h_f, whh_f, preferred_element_type=jnp.float32) + bhh_f
        gh_b = jnp.dot(h_b, whh_b, preferred_element_type=jnp.float32) + bhh_b
        h_f = gru_update(gif_ref[i], gh_f, h_f)
        h_b = gru_update(gib_ref[tb], gh_b, h_b)
        out_f_ref[i] = h_f
        out_b_ref[tb] = h_b
        return (h_f, h_b)

    jax.lax.fori_loop(0, T, body, (h0, h0))


def bigru(x, g, *, batch_tile=128):
    """x: (N, T, In) batch-major -> (N, T, 2H).  g: dict with wih_f/whh_f/bih_f/bhh_f + _b."""
    N, T, In = x.shape
    H = g["whh_f"].shape[0]
    tile_n = N if N <= batch_tile else batch_tile     # multiple of 8 (128) or == full N
    xt = jnp.transpose(x, (1, 0, 2))                  # time-major (T, N, In)
    full2d = lambda i: (0, 0)
    out_f, out_b = pl.pallas_call(
        _bigru_kernel,
        grid=(pl.cdiv(N, tile_n),),
        in_specs=[
            pl.BlockSpec((T, tile_n, In), lambda i: (0, i, 0)),
            pl.BlockSpec((In, 3 * H), full2d), pl.BlockSpec((H, 3 * H), full2d),
            pl.BlockSpec((1, 3 * H), full2d), pl.BlockSpec((1, 3 * H), full2d),
            pl.BlockSpec((In, 3 * H), full2d), pl.BlockSpec((H, 3 * H), full2d),
            pl.BlockSpec((1, 3 * H), full2d), pl.BlockSpec((1, 3 * H), full2d),
        ],
        out_specs=(pl.BlockSpec((T, tile_n, H), lambda i: (0, i, 0)),
                   pl.BlockSpec((T, tile_n, H), lambda i: (0, i, 0))),
        out_shape=(jax.ShapeDtypeStruct((T, N, H), jnp.float32),
                   jax.ShapeDtypeStruct((T, N, H), jnp.float32)),
        scratch_shapes=[pltpu.VMEM((T, tile_n, 3 * H), jnp.float32),
                        pltpu.VMEM((T, tile_n, 3 * H), jnp.float32)],
        compiler_params=pltpu.CompilerParams(
            dimension_semantics=("parallel",),
            vmem_limit_bytes=_VMEM_LIMIT),
    )(xt, g["wih_f"], g["whh_f"], g["bih_f"], g["bhh_f"],
      g["wih_b"], g["whh_b"], g["bih_b"], g["bhh_b"])
    # Concatenate fwd|bwd and return batch-major (N, T, 2H); XLA fuses transpose + concat.
    return jnp.concatenate([jnp.transpose(out_f, (1, 0, 2)),
                            jnp.transpose(out_b, (1, 0, 2))], axis=-1)


# ----------------------------------------------------------------------------
# Kernel 2: word attention, ALL labels at once, gridded over batch tiles.
#   The tanh projection is computed once per tile; the label context dot and the weighted
#   sum are MXU contractions.
# ----------------------------------------------------------------------------
def _word_attn_kernel(h_ref, ww_ref, bw_ref, ctxT_ref, out_ref):
    Nt, S, D = h_ref.shape
    h = h_ref[...]                                     # (Nt, S, D)
    u = jnp.tanh(jnp.dot(h.reshape(Nt * S, D), ww_ref[...],
                         preferred_element_type=jnp.float32) + bw_ref[...])
    logits = jnp.dot(u, ctxT_ref[...], preferred_element_type=jnp.float32)   # (Nt*S, L)
    L = logits.shape[-1]
    logits = logits.reshape(Nt, S, L)
    m = jnp.max(logits, axis=1, keepdims=True)
    e = jnp.exp(logits - m)
    p = e / jnp.sum(e, axis=1, keepdims=True)          # softmax over words S, per (n, l)
    # out[n, l, d] = sum_s p[n, s, l] * h[n, s, d]  (batched MXU contraction over n)
    out_ref[...] = jax.lax.dot_general(
        p, h, (((1,), (1,)), ((0,), (0,))), preferred_element_type=jnp.float32)


def word_attention_per_label(h_word, Ww, bw, ctx_w, *, batch_tile=128):
    N, S, D = h_word.shape
    L = ctx_w.shape[0]
    tile_n = N if N <= batch_tile else batch_tile
    out_nld = pl.pallas_call(
        _word_attn_kernel,
        grid=(pl.cdiv(N, tile_n),),
        in_specs=[
            pl.BlockSpec((tile_n, S, D), lambda i: (i, 0, 0)),
            pl.BlockSpec((D, D), lambda i: (0, 0)),
            pl.BlockSpec((1, D), lambda i: (0, 0)),
            pl.BlockSpec((D, L), lambda i: (0, 0)),
        ],
        out_specs=pl.BlockSpec((tile_n, L, D), lambda i: (i, 0, 0)),
        out_shape=jax.ShapeDtypeStruct((N, L, D), jnp.float32),
        compiler_params=pltpu.CompilerParams(
            dimension_semantics=("parallel",),
            vmem_limit_bytes=_VMEM_LIMIT),
    )(h_word, Ww, bw, jnp.transpose(ctx_w))
    return jnp.transpose(out_nld, (1, 0, 2))           # (L, N, D)


# ----------------------------------------------------------------------------
# Kernel 3: per-label sentence attention + label-wise output projection.  grid over labels L.
#   (h depends on the label here, so there is no per-label redundancy to hoist.)
# ----------------------------------------------------------------------------
def _sent_attn_output_kernel(h_ref, ws_ref, bs_ref, ctx_ref, wout_ref, bout_ref, out_ref):
    h = h_ref[0]                                       # (Bp, Dm, 2Hs)
    Bp, Dm, H2 = h.shape
    Hs = ws_ref.shape[1]
    u = jnp.tanh(jnp.dot(h.reshape(Bp * Dm, H2), ws_ref[...],
                         preferred_element_type=jnp.float32) + bs_ref[...])
    u = u.reshape(Bp, Dm, Hs)
    att_logits = jnp.sum(u * ctx_ref[...], axis=-1)    # (Bp, Dm)
    m = jnp.max(att_logits, axis=-1, keepdims=True)
    e = jnp.exp(att_logits - m)
    p = e / jnp.sum(e, axis=-1, keepdims=True)         # softmax over sentences
    # dropout(p=0.5) -> identity at inference
    doc = jnp.sum(p[..., None] * h, axis=1)            # (Bp, 2Hs)
    scores = jnp.sum(doc * wout_ref[0], axis=-1)       # (Bp,) label-wise projection column
    out_ref[0] = scores[None, :] + bout_ref[0]         # (1, Bp)


def sentence_attention_and_output(h_sent, Ws, bs, ctx_s, W_out, b_out):
    L, Bp, Dm, H2 = h_sent.shape
    Hs = Ws.shape[1]
    logits_lb = pl.pallas_call(
        _sent_attn_output_kernel,
        grid=(L,),
        in_specs=[
            pl.BlockSpec((1, Bp, Dm, H2), lambda l: (l, 0, 0, 0)),
            pl.BlockSpec((H2, Hs), lambda l: (0, 0)),
            pl.BlockSpec((1, Hs), lambda l: (0, 0)),
            pl.BlockSpec((1, 1, Hs), lambda l: (l, 0, 0)),
            pl.BlockSpec((1, 1, H2), lambda l: (l, 0, 0)),
            pl.BlockSpec((1, 1, 1), lambda l: (l, 0, 0)),
        ],
        out_specs=pl.BlockSpec((1, 1, Bp), lambda l: (l, 0, 0)),
        out_shape=jax.ShapeDtypeStruct((L, 1, Bp), jnp.float32),
        compiler_params=pltpu.CompilerParams(
            dimension_semantics=("parallel",),
            vmem_limit_bytes=_VMEM_LIMIT),
    )(h_sent, Ws, bs, ctx_s.reshape(L, 1, Hs),
      jnp.transpose(W_out).reshape(L, 1, H2), b_out.reshape(L, 1, 1))
    return jnp.transpose(logits_lb[:, 0, :], (1, 0))    # (B', L)


# ----------------------------------------------------------------------------
# Full HLAN forward (glue in plain JAX, hot paths in the kernels above).
# ----------------------------------------------------------------------------
def hlan_forward(x, params):
    data, document_lengths, sentence_lengths = x        # sentence_lengths unused (as in torch fwd)
    B, Dmax, S, E = data.shape
    document_length = int(document_lengths.max())        # .item() in torch -> static int here
    words = data.reshape(B * Dmax, S, E)

    # word-level bidirectional GRU
    h_word = bigru(words, params["word_gru"])             # (B*Dmax, S, 2Hw)

    # per-label word attention (label-independent projection computed once)
    sents = word_attention_per_label(h_word, params["Ww"], params["bw"], params["ctx_w"])
    L, N, H2w = sents.shape
    # NOTE: as in the torch module, this regrouping assumes document_length == Dmax.
    sents = sents.reshape(L, -1, document_length, H2w)    # (L, B', D, 2Hw)
    Bp = sents.shape[1]

    # per-label sentence-level bidirectional GRU: labels folded into the batch dim
    h_sent = bigru(sents.reshape(L * Bp, document_length, H2w), params["sent_gru"])
    H2s = h_sent.shape[-1]
    h_sent = h_sent.reshape(L, Bp, document_length, H2s)  # (L, B', D, 2Hs)

    # per-label sentence attention + label-wise output
    return sentence_attention_and_output(h_sent, params["Ws"], params["bs"],
                                         params["ctx_s"], params["W_out"], params["b_out"])


# ----------------------------------------------------------------------------
# Pure-JAX reference (same math) for a correctness check.
# ----------------------------------------------------------------------------
def _ref_gru_dir(x, wih, whh, bih, bhh, reverse=False):
    N, T, In = x.shape
    H = whh.shape[0]

    def step(h, x_t):
        gi = x_t @ wih + bih
        gh = h @ whh + bhh
        r = jax.nn.sigmoid(gi[:, :H] + gh[:, :H])
        z = jax.nn.sigmoid(gi[:, H:2 * H] + gh[:, H:2 * H])
        n = jnp.tanh(gi[:, 2 * H:] + r * gh[:, 2 * H:])
        h_new = (1.0 - z) * n + z * h
        return h_new, h_new

    xs = jnp.transpose(x, (1, 0, 2))
    if reverse:
        xs = xs[::-1]
    _, hs = jax.lax.scan(step, jnp.zeros((N, H), x.dtype), xs)
    if reverse:
        hs = hs[::-1]
    return jnp.transpose(hs, (1, 0, 2))


def _ref_bigru(x, g):
    hf = _ref_gru_dir(x, g["wih_f"], g["whh_f"], g["bih_f"], g["bhh_f"], False)
    hb = _ref_gru_dir(x, g["wih_b"], g["whh_b"], g["bih_b"], g["bhh_b"], True)
    return jnp.concatenate([hf, hb], axis=-1)


def ref_forward(data, document_length, p):
    B, Dmax, S, E = data.shape
    Hw = p["word_gru"]["whh_f"].shape[0]
    Hs = p["sent_gru"]["whh_f"].shape[0]
    L = p["ctx_w"].shape[0]
    words = data.reshape(-1, S, E)
    hw = _ref_bigru(words, p["word_gru"])
    N = hw.shape[0]
    u = jnp.tanh(hw.reshape(-1, 2 * Hw) @ p["Ww"] + p["bw"]).reshape(N, S, 2 * Hw)
    al = jnp.einsum("nsd,ld->lns", u, p["ctx_w"])
    pa = jax.nn.softmax(al, axis=-1)
    sents = jnp.einsum("lns,nsd->lnd", pa, hw)
    sents = sents.reshape(L, -1, document_length, 2 * Hw)
    Bp = sents.shape[1]
    hs = _ref_bigru(sents.reshape(L * Bp, document_length, 2 * Hw), p["sent_gru"])
    hs = hs.reshape(L, Bp, document_length, 2 * Hs)
    us = jnp.tanh(hs.reshape(-1, 2 * Hs) @ p["Ws"] + p["bs"]).reshape(L, Bp, document_length, Hs)
    al2 = jnp.sum(us * p["ctx_s"][:, None, None, :], axis=-1)
    pa2 = jax.nn.softmax(al2, axis=-1)
    docs = jnp.sum(pa2[..., None] * hs, axis=2)                       # (L, B', 2Hs)
    logits_lb = jnp.sum(docs * jnp.transpose(p["W_out"])[:, None, :], axis=-1)  # (L, B')
    return jnp.transpose(logits_lb) + p["b_out"]


# ----------------------------------------------------------------------------
# Deterministic parameter init (shapes follow HLAN.__init__; random so attention is
# non-degenerate).
# ----------------------------------------------------------------------------
def init_params(key, E, Hw, Hs, L):
    ks = jax.random.split(key, 24)

    def rn(k, shape, scale=0.2):
        return scale * jax.random.normal(k, shape, jnp.float32)

    word_gru = dict(
        wih_f=rn(ks[0], (E, 3 * Hw)), whh_f=rn(ks[1], (Hw, 3 * Hw)),
        bih_f=rn(ks[2], (1, 3 * Hw)), bhh_f=rn(ks[3], (1, 3 * Hw)),
        wih_b=rn(ks[4], (E, 3 * Hw)), whh_b=rn(ks[5], (Hw, 3 * Hw)),
        bih_b=rn(ks[6], (1, 3 * Hw)), bhh_b=rn(ks[7], (1, 3 * Hw)),
    )
    sent_gru = dict(
        wih_f=rn(ks[8], (2 * Hw, 3 * Hs)), whh_f=rn(ks[9], (Hs, 3 * Hs)),
        bih_f=rn(ks[10], (1, 3 * Hs)), bhh_f=rn(ks[11], (1, 3 * Hs)),
        wih_b=rn(ks[12], (2 * Hw, 3 * Hs)), whh_b=rn(ks[13], (Hs, 3 * Hs)),
        bih_b=rn(ks[14], (1, 3 * Hs)), bhh_b=rn(ks[15], (1, 3 * Hs)),
    )
    return dict(
        word_gru=word_gru,
        sent_gru=sent_gru,
        Ww=rn(ks[16], (2 * Hw, 2 * Hw)),   # word_level_attention Linear (stored input-major)
        bw=rn(ks[17], (1, 2 * Hw)),
        ctx_w=rn(ks[18], (L, 2 * Hw)),     # context_vector_word
        Ws=rn(ks[19], (2 * Hs, Hs)),       # sentence_level_attention Linear
        bs=rn(ks[20], (1, Hs)),
        ctx_s=rn(ks[21], (L, 2 * Hw)),     # context_vector_sentence  (2*Hw == Hs)
        W_out=rn(ks[22], (2 * Hs, L)),     # W_output
        b_out=rn(ks[23], (L,)),            # b_output
    )


if __name__ == "__main__":
    # Small, module-consistent sizes: sentence_level_hidden_size = 2 * word_level_hidden_size
    B, Dmax, S, E = 2, 4, 8, 16            # batch, max doc len (sentences), sentence len, embed
    Hw, Hs, L = 8, 16, 4                   # word hidden, sentence hidden (=2*Hw), num labels

    key = jax.random.PRNGKey(0)
    pkey, dkey = jax.random.split(key)
    params = init_params(pkey, E, Hw, Hs, L)

    data = jax.random.normal(dkey, (B, Dmax, S, E), jnp.float32)
    document_lengths = jnp.full((B,), Dmax, dtype=jnp.int32)
    sentence_lengths = jnp.full((B, Dmax), S, dtype=jnp.int32)

    logits = hlan_forward((data, document_lengths, sentence_lengths), params)
    logits = jax.block_until_ready(logits)
    assert logits.shape == (B, L)

    ref = ref_forward(data, int(document_lengths.max()), params)
    np.testing.assert_allclose(np.asarray(logits), np.asarray(ref), rtol=2e-2, atol=2e-2)

    print("KERNEL_OK")
</pallas_src>

<mosaic_0001>
module attributes {stable_mosaic.version = 11 : i64} {
  func.func @_bigru_kernel(%arg0: i32, %arg1: memref<8x8x16xf32, #tpu.memory_space<vmem>>, %arg2: memref<16x24xf32, #tpu.memory_space<vmem>>, %arg3: memref<8x24xf32, #tpu.memory_space<vmem>>, %arg4: memref<1x24xf32, #tpu.memory_space<vmem>>, %arg5: memref<1x24xf32, #tpu.memory_space<vmem>>, %arg6: memref<16x24xf32, #tpu.memory_space<vmem>>, %arg7: memref<8x24xf32, #tpu.memory_space<vmem>>, %arg8: memref<1x24xf32, #tpu.memory_space<vmem>>, %arg9: memref<1x24xf32, #tpu.memory_space<vmem>>, %arg10: memref<8x8x8xf32, #tpu.memory_space<vmem>>, %arg11: memref<8x8x8xf32, #tpu.memory_space<vmem>>, %arg12: memref<8x8x24xf32, #tpu.memory_space<vmem>>, %arg13: memref<8x8x24xf32, #tpu.memory_space<vmem>>) attributes {dimension_semantics = [#tpu.dimension_semantics<parallel>], iteration_bounds = array<i64: 1>, scalar_prefetch = 0 : i64, scratch_operands = 2 : i64, tpu.core_type = #tpu.core_type<tc>, window_params = [{transform_indices = @transform_0, window_bounds = array<i64: 8, 8, 16>}, {pipeline_mode = #tpu.pipeline_mode<synchronous>, transform_indices = @transform_1, window_bounds = array<i64: 16, 24>}, {pipeline_mode = #tpu.pipeline_mode<synchronous>, transform_indices = @transform_2, window_bounds = array<i64: 8, 24>}, {pipeline_mode = #tpu.pipeline_mode<synchronous>, transform_indices = @transform_3, window_bounds = array<i64: 1, 24>}, {pipeline_mode = #tpu.pipeline_mode<synchronous>, transform_indices = @transform_4, window_bounds = array<i64: 1, 24>}, {pipeline_mode = #tpu.pipeline_mode<synchronous>, transform_indices = @transform_5, window_bounds = array<i64: 16, 24>}, {pipeline_mode = #tpu.pipeline_mode<synchronous>, transform_indices = @transform_6, window_bounds = array<i64: 8, 24>}, {pipeline_mode = #tpu.pipeline_mode<synchronous>, transform_indices = @transform_7, window_bounds = array<i64: 1, 24>}, {pipeline_mode = #tpu.pipeline_mode<synchronous>, transform_indices = @transform_8, window_bounds = array<i64: 1, 24>}, {transform_indices = @transform_9, window_bounds = array<i64: 8, 8, 8>}, {transform_indices = @transform_10, window_bounds = array<i64: 8, 8, 8>}]} {
    %c0 = arith.constant 0 : index
    %c0_0 = arith.constant 0 : index
    %c0_1 = arith.constant 0 : index
    %0 = vector.load %arg1[%c0, %c0_0, %c0_1] : memref<8x8x16xf32, #tpu.memory_space<vmem>>, vector<8x8x16xf32>
    %1 = vector.shape_cast %0 : vector<8x8x16xf32> to vector<64x16xf32>
    %c0_2 = arith.constant 0 : index
    %c0_3 = arith.constant 0 : index
    %2 = vector.load %arg2[%c0_2, %c0_3] : memref<16x24xf32, #tpu.memory_space<vmem>>, vector<16x24xf32>
    %cst = arith.constant dense<0.000000e+00> : vector<64x24xf32>
    %3 = tpu.matmul %1, %2, %cst {dimension_numbers = #tpu.dot_dimension_numbers<[1], [0], [0], [1], [0, 0, 1, 1], [], []>} : vector<64x16xf32>, vector<16x24xf32>, vector<64x24xf32> -> vector<64x24xf32>
    %c0_4 = arith.constant 0 : index
    %c0_5 = arith.constant 0 : index
    %4 = vector.load %arg4[%c0_4, %c0_5] : memref<1x24xf32, #tpu.memory_space<vmem>>, vector<1x24xf32>
    %5 = vector.broadcast %4 : vector<1x24xf32> to vector<64x24xf32>
    %6 = arith.addf %3, %5 : vector<64x24xf32>
    %7 = vector.shape_cast %6 : vector<64x24xf32> to vector<8x8x24xf32>
    %c0_6 = arith.constant 0 : index
    %c0_7 = arith.constant 0 : index
    %c0_8 = arith.constant 0 : index
    %8 = vector.load %arg12[%c0_6, %c0_7, %c0_8] : memref<8x8x24xf32, #tpu.memory_space<vmem>>, vector<8x8x24xf32>
    tpu.vector_store %arg12[%c0_6, %c0_7, %c0_8], %7 {strides = array<i32>} : memref<8x8x24xf32, #tpu.memory_space<vmem>>, vector<8x8x24xf32>,
    %c0_9 = arith.constant 0 : index
    %c0_10 = arith.constant 0 : index
    %9 = vector.load %arg6[%c0_9, %c0_10] : memref<16x24xf32, #tpu.memory_space<vmem>>, vector<16x24xf32>
    %cst_11 = arith.constant dense<0.000000e+00> : vector<64x24xf32>
    %10 = tpu.matmul %1, %9, %cst_11 {dimension_numbers = #tpu.dot_dimension_numbers<[1], [0], [0], [1], [0, 0, 1, 1], [], []>} : vector<64x16xf32>, vector<16x24xf32>, vector<64x24xf32> -> vector<64x24xf32>
    %c0_12 = arith.constant 0 : index
    %c0_13 = arith.constant 0 : index
    %11 = vector.load %arg8[%c0_12, %c0_13] : memref<1x24xf32, #tpu.memory_space<vmem>>, vector<1x24xf32>
    %12 = vector.broadcast %11 : vector<1x24xf32> to vector<64x24xf32>
    %13 = arith.addf %10, %12 : vector<64x24xf32>
    %14 = vector.shape_cast %13 : vector<64x24xf32> to vector<8x8x24xf32>
    %c0_14 = arith.constant 0 : index
    %c0_15 = arith.constant 0 : index
    %c0_16 = arith.constant 0 : index
    %15 = vector.load %arg13[%c0_14, %c0_15, %c0_16] : memref<8x8x24xf32, #tpu.memory_space<vmem>>, vector<8x8x24xf32>
    tpu.vector_store %arg13[%c0_14, %c0_15, %c0_16], %14 {strides = array<i32>} : memref<8x8x24xf32, #tpu.memory_space<vmem>>, vector<8x8x24xf32>,
    %c0_17 = arith.constant 0 : index
    %c0_18 = arith.constant 0 : index
    %16 = vector.load %arg3[%c0_17, %c0_18] : memref<8x24xf32, #tpu.memory_space<vmem>>, vector<8x24xf32>
    %c0_19 = arith.constant 0 : index
    %c0_20 = arith.constant 0 : index
    %17 = vector.load %arg7[%c0_19, %c0_20] : memref<8x24xf32, #tpu.memory_space<vmem>>, vector<8x24xf32>
    %c0_21 = arith.constant 0 : index
    %c0_22 = arith.constant 0 : index
    %18 = vector.load %arg5[%c0_21, %c0_22] : memref<1x24xf32, #tpu.memory_space<vmem>>, vector<1x24xf32>
    %c0_23 = arith.constant 0 : index
    %c0_24 = arith.constant 0 : index
    %19 = vector.load %arg9[%c0_23, %c0_24] : memref<1x24xf32, #tpu.memory_space<vmem>>, vector<1x24xf32>
    %cst_25 = arith.constant 0.000000e+00 : f32
    %20 = vector.broadcast %cst_25 : f32 to vector<8x8xf32>
    %c0_i32 = arith.constant 0 : i32
    %c8_i32 = arith.constant 8 : i32
    %21 = arith.addi %c0_i32, %c8_i32 : i32
    %c1_i32 = arith.constant 1 : i32
    %22:2 = scf.for %arg14 = %c0_i32 to %21 step %c1_i32 iter_args(%arg15 = %20, %arg16 = %20) -> (vector<8x8xf32>, vector<8x8xf32>)  : i32 {
      %c7_i32 = arith.constant 7 : i32
      %23 = arith.subi %c7_i32, %arg14 : i32
      %cst_27 = arith.constant dense<0.000000e+00> : vector<8x24xf32>
      %24 = tpu.matmul %arg15, %16, %cst_27 {dimension_numbers = #tpu.dot_dimension_numbers<[1], [0], [0], [1], [0, 0, 1, 1], [], []>} : vector<8x8xf32>, vector<8x24xf32>, vector<8x24xf32> -> vector<8x24xf32>
      %25 = vector.broadcast %18 : vector<1x24xf32> to vector<8x24xf32>
      %26 = arith.addf %24, %25 : vector<8x24xf32>
      %cst_28 = arith.constant dense<0.000000e+00> : vector<8x24xf32>
      %27 = tpu.matmul %arg16, %17, %cst_28 {dimension_numbers = #tpu.dot_dimension_numbers<[1], [0], [0], [1], [0, 0, 1, 1], [], []>} : vector<8x8xf32>, vector<8x24xf32>, vector<8x24xf32> -> vector<8x24xf32>
      %28 = vector.broadcast %19 : vector<1x24xf32> to vector<8x24xf32>
      %29 = arith.addf %27, %28 : vector<8x24xf32>
      %30 = arith.index_cast %arg14 : i32 to index
      %c0_29 = arith.constant 0 : index
      %c0_30 = arith.constant 0 : index
      %31 = vector.load %arg12[%30, %c0_29, %c0_30] : memref<8x8x24xf32, #tpu.memory_space<vmem>>, vector<1x8x24xf32>
      %32 = vector.shape_cast %31 : vector<1x8x24xf32> to vector<8x24xf32>
      %33 = vector.extract_strided_slice %32 {offsets = [0, 0], sizes = [8, 8], strides = [1, 1]} : vector<8x24xf32> to vector<8x8xf32>
      %34 = vector.extract_strided_slice %26 {offsets = [0, 0], sizes = [8, 8], strides = [1, 1]} : vector<8x24xf32> to vector<8x8xf32>
      %35 = arith.addf %33, %34 : vector<8x8xf32>
      %36 = arith.negf %35 : vector<8x8xf32>
      %37 = math.exp %36 : vector<8x8xf32>
      %cst_31 = arith.constant 1.000000e+00 : f32
      %38 = vector.broadcast %cst_31 : f32 to vector<8x8xf32>
      %39 = arith.addf %38, %37 : vector<8x8xf32>
      %40 = arith.divf %38, %39 : vector<8x8xf32>
      %41 = vector.extract_strided_slice %32 {offsets = [0, 8], sizes = [8, 8], strides = [1, 1]} : vector<8x24xf32> to vector<8x8xf32>
      %42 = vector.extract_strided_slice %26 {offsets = [0, 8], sizes = [8, 8], strides = [1, 1]} : vector<8x24xf32> to vector<8x8xf32>
      %43 = arith.addf %41, %42 : vector<8x8xf32>
      %44 = arith.negf %43 : vector<8x8xf32>
      %45 = math.exp %44 : vector<8x8xf32>
      %cst_32 = arith.constant 1.000000e+00 : f32
      %46 = vector.broadcast %cst_32 : f32 to vector<8x8xf32>
      %47 = arith.addf %46, %45 : vector<8x8xf32>
      %48 = arith.divf %46, %47 : vector<8x8xf32>
      %49 = vector.extract_strided_slice %32 {offsets = [0, 16], sizes = [8, 8], strides = [1, 1]} : vector<8x24xf32> to vector<8x8xf32>
      %50 = vector.extract_strided_slice %26 {offsets = [0, 16], sizes = [8, 8], strides = [1, 1]} : vector<8x24xf32> to vector<8x8xf32>
      %51 = arith.mulf %40, %50 : vector<8x8xf32>
      %52 = arith.addf %49, %51 : vector<8x8xf32>
      %53 = math.tanh %52 : vector<8x8xf32>
      %cst_33 = arith.constant 1.000000e+00 : f32
      %54 = vector.broadcast %cst_33 : f32 to vector<8x8xf32>
      %55 = arith.subf %54, %48 : vector<8x8xf32>
      %56 = arith.mulf %55, %53 : vector<8x8xf32>
      %57 = arith.mulf %48, %arg15 : vector<8x8xf32>
      %58 = arith.addf %56, %57 : vector<8x8xf32>
      %59 = arith.index_cast %23 : i32 to index
      %c0_34 = arith.constant 0 : index
      %c0_35 = arith.constant 0 : index
      %60 = vector.load %arg13[%59, %c0_34, %c0_35] : memref<8x8x24xf32, #tpu.memory_space<vmem>>, vector<1x8x24xf32>
      %61 = vector.shape_cast %60 : vector<1x8x24xf32> to vector<8x24xf32>
      %62 = vector.extract_strided_slice %61 {offsets = [0, 0], sizes = [8, 8], strides = [1, 1]} : vector<8x24xf32> to vector<8x8xf32>
      %63 = vector.extract_strided_slice %29 {offsets = [0, 0], sizes = [8, 8], strides = [1, 1]} : vector<8x24xf32> to vector<8x8xf32>
      %64 = arith.addf %62, %63 : vector<8x8xf32>
      %65 = arith.negf %64 : vector<8x8xf32>
      %66 = math.exp %65 : vector<8x8xf32>
      %cst_36 = arith.constant 1.000000e+00 : f32
      %67 = vector.broadcast %cst_36 : f32 to vector<8x8xf32>
      %68 = arith.addf %67, %66 : vector<8x8xf32>
      %69 = arith.divf %67, %68 : vector<8x8xf32>
      %70 = vector.extract_strided_slice %61 {offsets = [0, 8], sizes = [8, 8], strides = [1, 1]} : vector<8x24xf32> to vector<8x8xf32>
      %71 = vector.extract_strided_slice %29 {offsets = [0, 8], sizes = [8, 8], strides = [1, 1]} : vector<8x24xf32> to vector<8x8xf32>
      %72 = arith.addf %70, %71 : vector<8x8xf32>
      %73 = arith.negf %72 : vector<8x8xf32>
      %74 = math.exp %73 : vector<8x8xf32>
      %cst_37 = arith.constant 1.000000e+00 : f32
      %75 = vector.broadcast %cst_37 : f32 to vector<8x8xf32>
      %76 = arith.addf %75, %74 : vector<8x8xf32>
      %77 = arith.divf %75, %76 : vector<8x8xf32>
      %78 = vector.extract_strided_slice %61 {offsets = [0, 16], sizes = [8, 8], strides = [1, 1]} : vector<8x24xf32> to vector<8x8xf32>
      %79 = vector.extract_strided_slice %29 {offsets = [0, 16], sizes = [8, 8], strides = [1, 1]} : vector<8x24xf32> to vector<8x8xf32>
      %80 = arith.mulf %69, %79 : vector<8x8xf32>
      %81 = arith.addf %78, %80 : vector<8x8xf32>
      %82 = math.tanh %81 : vector<8x8xf32>
      %cst_38 = arith.constant 1.000000e+00 : f32
      %83 = vector.broadcast %cst_38 : f32 to vector<8x8xf32>
      %84 = arith.subf %83, %77 : vector<8x8xf32>
      %85 = arith.mulf %84, %82 : vector<8x8xf32>
      %86 = arith.mulf %77, %arg16 : vector<8x8xf32>
      %87 = arith.addf %85, %86 : vector<8x8xf32>
      %88 = arith.index_cast %arg14 : i32 to index
      %c0_39 = arith.constant 0 : index
      %c0_40 = arith.constant 0 : index
      %89 = vector.load %arg10[%88, %c0_39, %c0_40] : memref<8x8x8xf32, #tpu.memory_space<vmem>>, vector<1x8x8xf32>
      %90 = vector.shape_cast %89 : vector<1x8x8xf32> to vector<8x8xf32>
      %91 = vector.shape_cast %58 : vector<8x8xf32> to vector<1x8x8xf32>
      tpu.vector_store %arg10[%88, %c0_39, %c0_40], %91 {strides = array<i32>} : memref<8x8x8xf32, #tpu.memory_space<vmem>>, vector<1x8x8xf32>,
      %92 = arith.index_cast %23 : i32 to index
      %c0_41 = arith.constant 0 : index
      %c0_42 = arith.constant 0 : index
      %93 = vector.load %arg11[%92, %c0_41, %c0_42] : memref<8x8x8xf32, #tpu.memory_space<vmem>>, vector<1x8x8xf32>
      %94 = vector.shape_cast %93 : vector<1x8x8xf32> to vector<8x8xf32>
      %95 = vector.shape_cast %87 : vector<8x8xf32> to vector<1x8x8xf32>
      tpu.vector_store %arg11[%92, %c0_41, %c0_42], %95 {strides = array<i32>} : memref<8x8x8xf32, #tpu.memory_space<vmem>>, vector<1x8x8xf32>,
      scf.yield %58, %87 : vector<8x8xf32>, vector<8x8xf32>
    }
    %c8_i32_26 = arith.constant 8 : i32
    return
  }
  func.func @transform_0(%arg0: i32) -> (i32, i32, i32) {
    %c0_i32 = arith.constant 0 : i32
    %c0_i32_0 = arith.constant 0 : i32
    %c0_i32_1 = arith.constant 0 : i32
    return %c0_i32, %arg0, %c0_i32_0 : i32, i32, i32
  }
  func.func @transform_1(%arg0: i32) -> (i32, i32) {
    %c0_i32 = arith.constant 0 : i32
    %c0_i32_0 = arith.constant 0 : i32
    %c0_i32_1 = arith.constant 0 : i32
    return %c0_i32, %c0_i32_0 : i32, i32
  }
  func.func @transform_2(%arg0: i32) -> (i32, i32) {
    %c0_i32 = arith.constant 0 : i32
    %c0_i32_0 = arith.constant 0 : i32
    %c0_i32_1 = arith.constant 0 : i32
    return %c0_i32, %c0_i32_0 : i32, i32
  }
  func.func @transform_3(%arg0: i32) -> (i32, i32) {
    %c0_i32 = arith.constant 0 : i32
    %c0_i32_0 = arith.constant 0 : i32
    %c0_i32_1 = arith.constant 0 : i32
    return %c0_i32, %c0_i32_0 : i32, i32
  }
  func.func @transform_4(%arg0: i32) -> (i32, i32) {
    %c0_i32 = arith.constant 0 : i32
    %c0_i32_0 = arith.constant 0 : i32
    %c0_i32_1 = arith.constant 0 : i32
    return %c0_i32, %c0_i32_0 : i32, i32
  }
  func.func @transform_5(%arg0: i32) -> (i32, i32) {
    %c0_i32 = arith.constant 0 : i32
    %c0_i32_0 = arith.constant 0 : i32
    %c0_i32_1 = arith.constant 0 : i32
    return %c0_i32, %c0_i32_0 : i32, i32
  }
  func.func @transform_6(%arg0: i32) -> (i32, i32) {
    %c0_i32 = arith.constant 0 : i32
    %c0_i32_0 = arith.constant 0 : i32
    %c0_i32_1 = arith.constant 0 : i32
    return %c0_i32, %c0_i32_0 : i32, i32
  }
  func.func @transform_7(%arg0: i32) -> (i32, i32) {
    %c0_i32 = arith.constant 0 : i32
    %c0_i32_0 = arith.constant 0 : i32
    %c0_i32_1 = arith.constant 0 : i32
    return %c0_i32, %c0_i32_0 : i32, i32
  }
  func.func @transform_8(%arg0: i32) -> (i32, i32) {
    %c0_i32 = arith.constant 0 : i32
    %c0_i32_0 = arith.constant 0 : i32
    %c0_i32_1 = arith.constant 0 : i32
    return %c0_i32, %c0_i32_0 : i32, i32
  }
  func.func @transform_9(%arg0: i32) -> (i32, i32, i32) {
    %c0_i32 = arith.constant 0 : i32
    %c0_i32_0 = arith.constant 0 : i32
    %c0_i32_1 = arith.constant 0 : i32
    return %c0_i32, %arg0, %c0_i32_0 : i32, i32, i32
  }
  func.func @transform_10(%arg0: i32) -> (i32, i32, i32) {
    %c0_i32 = arith.constant 0 : i32
    %c0_i32_0 = arith.constant 0 : i32
    %c0_i32_1 = arith.constant 0 : i32
    return %c0_i32, %arg0, %c0_i32_0 : i32, i32, i32
  }
}

</mosaic_0001>

<bundles_post_ra>
// kernel: tpu_custom_call.1
= control target key start
LH: loop header
LB: loop body
LE: loop exit
PB: predicated region body
PF: predicated region fallthrough
CT: control target
= control target key end

     0   :  { %16 = vsyncpa [#allocation5], 0  ;;  %s1254_s0 = inlined_call_operand.hbm [shape: f32[8,8,16], index: 0, kind: input, shape index: {}]   ;;  %s1255_s1 = inlined_call_operand.hbm [shape: f32[16,24], index: 1, kind: input, shape index: {}]   ;;  %s1256_s2 = inlined_call_operand.hbm [shape: f32[8,24], index: 2, kind: input, shape index: {}]   ;;  %s1257_s3 = inlined_call_operand.vmem [shape: f32[1,24], index: 3, kind: input, shape index: {}]   ;;  %s1258_s4 = inlined_call_operand.vmem [shape: f32[1,24], index: 4, kind: input, shape index: {}]   ;;  %s1259_s5 = inlined_call_operand.vmem [shape: f32[16,24], index: 5, kind: input, shape index: {}]   ;;  %s1260_s6 = inlined_call_operand.hbm [shape: f32[8,24], index: 6, kind: input, shape index: {}]   ;;  %s1261_s7 = inlined_call_operand.vmem [shape: f32[1,24], index: 7, kind: input, shape index: {}]   ;;  %s1262_s8 = inlined_call_operand.vmem [shape: f32[1,24], index: 8, kind: input, shape index: {}]   ;;  %s1263_s9 = inlined_call_operand.hbm [shape: f32[8,8,8], index: 9, kind: output, shape index: {0}]   ;;  %s1264_s10 = inlined_call_operand.hbm [shape: f32[8,8,8], index: 10, kind: output, shape index: {1}]  }
   0x1   :  { %17 = vsyncpa [#allocation8], 0 }
   0x2   :  { %18 = vsyncpa [#allocation11], 0 }
   0x3   :  { %19 = vsyncpa [#allocation6], 0 }
   0x4   :  { %20 = vsyncpa [#allocation14], 0  ;;  %s980_s13 = smov [#allocation7]   ;;  %s981_s15 = smov [#allocation4]  }
   0x5   :  { %s38_s14 = sshll.u32 %s980_s13, 4  ;;  %s26_s16 = sshll.u32 %s981_s15, 4  ;;  %s39_s14 = int_to_ptr.vmem [resolvable:$true] %s38_s14  ;;  %s1048_s16 = int_to_ptr.vmem [resolvable:$true] %s26_s16 }
   0x6   :  { %s814_s19 = scalar_lea.hbm %s1255_s1, 256 }
   0x7   :  { %p815_p0 = scmp.ne.s32.totalorder %s1255_s1, %s814_s19  ;;  %p818_p1 = scmp.lt.u32.totalorder %s814_s19, %s1255_s1 }
   0x9   :  { %p820_p2 = pnand %p818_p1, %p815_p0 }
   0xb   :  { %823 = shalt.err (!%p820_p2)
}
   0xc   :  { %s824_s24 = scalar_lea.vmem %s39_s14, 256  ;;  %p829_p4 = scmp.lt.s32.totalorder %s39_s14, %s39_s14 }
   0xd   :  { %p825_p3 = scmp.ne.s32.totalorder %s39_s14, %s824_s24  ;;  %p830_p5 = scmp.lt.s32.totalorder %s824_s24, %s824_s24 }
   0xf   :  { %p831_p6 = por %p830_p5, %p829_p4 }
  0x11   :  { %p832_p7 = pnand %p831_p6, %p825_p3 }
  0x13   :  { %835 = shalt.err (!%p832_p7)
}
  0x14   :  { %s982_s25 = smov 128   ;;  %s983_s26 = smov 8  }
  0x15   :  { %44 = dma.hbm_to_vmem [thread:$0]  %s1255_s1, 256, %s39_s14, [#allocation8], %s982_s25, %s982_s25, %s983_s26  }
  0x16   :  { %s836_s11 = scalar_lea.hbm %s1254_s0, 1024 }
  0x17   :  { %p837_p8 = scmp.ne.s32.totalorder %s1254_s0, %s836_s11  ;;  %p840_p9 = scmp.lt.u32.totalorder %s836_s11, %s1254_s0 }
  0x19   :  { %p842_p10 = pnand %p840_p9, %p837_p8 }
  0x1b   :  { %845 = shalt.err (!%p842_p10)
}
  0x1c   :  { %s846_s18 = scalar_lea.vmem %s1048_s16, 1024  ;;  %p851_p12 = scmp.lt.s32.totalorder %s1048_s16, %s1048_s16 }
  0x1d   :  { %p847_p11 = scmp.ne.s32.totalorder %s1048_s16, %s846_s18  ;;  %p852_p13 = scmp.lt.s32.totalorder %s846_s18, %s846_s18 }
  0x1f   :  { %p853_p0 = por %p852_p13, %p851_p12 }
  0x21   :  { %p854_p1 = pnand %p853_p0, %p847_p11 }
  0x23   :  { %857 = shalt.err (!%p854_p1)
}
  0x24   :  { %32 = dma.hbm_to_vmem [thread:$0]  %s1254_s0, 1024, %s1048_s16, [#allocation5], %s982_s25, %s982_s25, %s983_s26  }
  0x25   :  { %s984_s19 = smov [#allocation9]   ;;  %s985_s21 = smov [#allocation10]  }
  0x26   :  { %s51_s20 = sshll.u32 %s984_s19, 4  ;;  %s67_s22 = sshll.u32 %s985_s21, 4  ;;  %s52_s20 = int_to_ptr.vmem [resolvable:$true] %s51_s20  ;;  %s68_s22 = int_to_ptr.vmem [resolvable:$true] %s67_s22 }
  0x27   :  { %s858_s27 = scalar_lea.hbm %s1256_s2, 128 }
  0x28   :  { %p859_p2 = scmp.ne.s32.totalorder %s1256_s2, %s858_s27  ;;  %p862_p3 = scmp.lt.u32.totalorder %s858_s27, %s1256_s2 }
  0x2a   :  { %p864_p4 = pnand %p862_p3, %p859_p2 }
  0x2c   :  { %867 = shalt.err (!%p864_p4)
}
  0x2d   :  { %s868_s0 = scalar_lea.vmem %s52_s20, 128  ;;  %p873_p6 = scmp.lt.s32.totalorder %s52_s20, %s52_s20 }
  0x2e   :  { %p869_p5 = scmp.ne.s32.totalorder %s52_s20, %s868_s0  ;;  %p874_p7 = scmp.lt.s32.totalorder %s868_s0, %s868_s0 }
  0x30   :  { %p875_p8 = por %p874_p7, %p873_p6 }
  0x32   :  { %p876_p9 = pnand %p875_p8, %p869_p5 }
  0x34   :  { %879 = shalt.err (!%p876_p9)
}
  0x35   :  { %54 = dma.hbm_to_vmem [thread:$0]  %s1256_s2, 128, %s52_s20, [#allocation8]  }
  0x36   :  { %s880_s17 = scalar_lea.hbm %s1260_s6, 128 }
  0x37   :  { %p881_p10 = scmp.ne.s32.totalorder %s1260_s6, %s880_s17  ;;  %p884_p11 = scmp.lt.u32.totalorder %s880_s17, %s1260_s6 }
  0x39   :  { %p886_p12 = pnand %p884_p11, %p881_p10 }
  0x3b   :  { %889 = shalt.err (!%p886_p12)
}
  0x3c   :  { %s890_s21 = scalar_lea.vmem %s68_s22, 128  ;;  %p895_p0 = scmp.lt.s32.totalorder %s68_s22, %s68_s22 }
  0x3d   :  { %p891_p13 = scmp.ne.s32.totalorder %s68_s22, %s890_s21  ;;  %p896_p1 = scmp.lt.s32.totalorder %s890_s21, %s890_s21 }
  0x3f   :  { %p897_p2 = por %p896_p1, %p895_p0 }
  0x41   :  { %p898_p3 = pnand %p897_p2, %p891_p13 }
  0x43   :  { %901 = shalt.err (!%p898_p3)
}
  0x44   :  { %70 = dma.hbm_to_vmem [thread:$0]  %s1260_s6, 128, %s68_s22, [#allocation11]  }
  0x45   :  { %958 = dma.done.wait [#allocation5], 1024  }
  0x46   :  { %959 = vsyncadd [#allocation5], 4294966272 }
  0x47   :  { %960 = dma.done.wait [#allocation8], 384  }
  0x48   :  { %961 = vsyncadd [#allocation8], 4294966912 }
  0x49   :  { %962 = dma.done.wait [#allocation11], 128  }
  0x4a   :  { %963 = vsyncadd [#allocation11], 4294967168  ;;  %v1109_v0 = vld [vmem:[#allocation9] sm:$0xff]  ;;  %v1111_v1 = vld [vmem:[#allocation10] sm:$0xff]  ;;  %vm104_vm0 = vcmask 130048   ;;  %vm234_vm1 = vcmask 195584  }
  0x4b   :  { %v1116_v2 = vld [vmem:[%s1258_s4] ss:$0 sm:$0xff]  ;;  %v96_v5 = vld [vmem:[#allocation7 + $0x8] sm:$0xff]  ;;  %v89_v12 = vld [vmem:[#allocation4 + $0x10] sm:$0xff]  ;;  %v1167_v52 = vmov 0.0   ;;  %v1169_v53 = vmov 0.0  }
  0x4c   :  { %v1121_v3 = vld [vmem:[%s1262_s8] ss:$0 sm:$0xff]  ;;  %v244_v8 = vld [vmem:[%s1259_s5 + $0x8] sm:$0xff]  ;;  %v90_v13 = vld [vmem:[#allocation4 + $0x18] sm:$0xff] }
  0x4d   :  { %v95_v4 = vld [vmem:[#allocation7] sm:$0xff]  ;;  %v88_v11 = vld [vmem:[#allocation4 + $0x8] sm:$0xff]  ;;  %v93_v16 = vld [vmem:[#allocation4 + $0x30] sm:$0xff] }
  0x4e   :  { %v757_v6 = vpack.c.bf16 %v96_v5, %v95_v4  ;;  %v243_v7 = vld [vmem:[%s1259_s5] sm:$0xff]  ;;  %v92_v15 = vld [vmem:[#allocation4 + $0x28] sm:$0xff]  ;;  %v94_v17 = vld [vmem:[#allocation4 + $0x38] sm:$0xff] }
  0x4f   :  { %v87_v9 = vld [vmem:[#allocation4] sm:$0xff]  ;;  %v761_v10 = vpack.c.bf16 %v244_v8, %v243_v7 }
  0x50   :  { %719 = vmatprep.mubr.msk.f32.mxu0 %vm104_vm0, %v87_v9  ;;  %735 = vmatprep.mubr.msk.f32.mxu1 %vm104_vm0, %v87_v9  ;;  %v91_v14 = vld [vmem:[#allocation4 + $0x20] sm:$0xff] }
  0x51   :  { %758 = vmatprep.subr.bf16.mxu0 %v757_v6  ;;  %762 = vmatprep.subr.bf16.mxu1 %v761_v10  ;;  %v665_v18 = vld [vmem:[%s1257_s3] ss:$0 sm:$0xff]  ;;  %s1171_s3 = smov 0  }
  0x52   :  { %760 = vmatpush3.bf16.msra.mxu0 %v757_v6  ;;  %764 = vmatpush3.bf16.msra.mxu1 %v761_v10  ;;  %v674_v19 = vld [vmem:[%s1261_s7] ss:$0 sm:$0xff] }
  0x55   :  { %720 = vmatmul.mubr.msk.f32.vlgmr.msra.gmra.mrb[0].mxu0 %vm104_vm0, %v88_v11  ;;  %736 = vmatmul.mubr.msk.f32.vlgmr.msra.gmra.mrb[0].mxu1 %vm104_vm0, %v88_v11 }
  0x56   :  { %722 = vmatprep.mubr.msk.f32.mxu0 %vm104_vm0, %v89_v12  ;;  %738 = vmatprep.mubr.msk.f32.mxu1 %vm104_vm0, %v89_v12 }
  0x59   :  { %723 = vmatmul.mubr.msk.f32.gmra.mrb[2].mxu0 %vm104_vm0, %v90_v13  ;;  %739 = vmatmul.mubr.msk.f32.gmra.mrb[2].mxu1 %vm104_vm0, %v90_v13 }
  0x5a   :  { %725 = vmatprep.mubr.msk.f32.mxu0 %vm104_vm0, %v91_v14  ;;  %741 = vmatprep.mubr.msk.f32.mxu1 %vm104_vm0, %v91_v14 }
  0x5d   :  { %726 = vmatmul.mubr.msk.f32.gmra.mrb[4].mxu0 %vm104_vm0, %v92_v15  ;;  %742 = vmatmul.mubr.msk.f32.gmra.mrb[4].mxu1 %vm104_vm0, %v92_v15 }
  0x5e   :  { %728 = vmatprep.mubr.msk.f32.mxu0 %vm104_vm0, %v93_v16  ;;  %744 = vmatprep.mubr.msk.f32.mxu1 %vm104_vm0, %v93_v16 }
  0x61   :  { %729 = vmatmul.mubr.msk.f32.gmra.mrb[6].mxu0 %vm104_vm0, %v94_v17  ;;  %745 = vmatmul.mubr.msk.f32.gmra.mrb[6].mxu1 %vm104_vm0, %v94_v17 }
 0x128   :  { %v721_v20 = vpop.f32.mrb[0].mxu0  ;;  %v737_v22 = vpop.f32.mrb[0].mxu1 }
 0x129   :  { %v201_v21 = vadd.f32 %v721_v20, %v665_v18  ;;  %v195_v23 = vpop.f32.mrb[1].mxu0  ;;  %v324_v24 = vadd.f32 %v737_v22, %v674_v19  ;;  %v318_v26 = vpop.f32.mrb[1].mxu1 }
 0x12a   :  { %v196_v25 = vadd.f32 %v665_v18, %v195_v23  ;;  %v319_v27 = vadd.f32 %v674_v19, %v318_v26 }
 0x12b   :  { %236 = vst.msk [vmem:[#allocation2 + $0x8] sm:$0xff] %vm234_vm1, %v201_v21  ;;  %358 = vst.msk [vmem:[#allocation3 + $0x8] sm:$0xff] %vm234_vm1, %v324_v24 }
 0x12c   :  { %235 = vst.msk [vmem:[#allocation2] sm:$0xff] %vm234_vm1, %v196_v25  ;;  %v724_v28 = vpop.f32.mrb[2].mxu0  ;;  %357 = vst.msk [vmem:[#allocation3] sm:$0xff] %vm234_vm1, %v319_v27  ;;  %v740_v30 = vpop.f32.mrb[2].mxu1 }
 0x12d   :  { %v211_v29 = vadd.f32 %v724_v28, %v665_v18  ;;  %v205_v31 = vpop.f32.mrb[3].mxu0  ;;  %v334_v32 = vadd.f32 %v740_v30, %v674_v19  ;;  %v328_v34 = vpop.f32.mrb[3].mxu1 }
 0x12e   :  { %v206_v33 = vadd.f32 %v665_v18, %v205_v31  ;;  %v329_v35 = vadd.f32 %v674_v19, %v328_v34 }
 0x12f   :  { %238 = vst.msk [vmem:[#allocation2 + $0x18] sm:$0xff] %vm234_vm1, %v211_v29  ;;  %360 = vst.msk [vmem:[#allocation3 + $0x18] sm:$0xff] %vm234_vm1, %v334_v32 }
 0x130   :  { %237 = vst.msk [vmem:[#allocation2 + $0x10] sm:$0xff] %vm234_vm1, %v206_v33  ;;  %v727_v36 = vpop.f32.mrb[4].mxu0  ;;  %359 = vst.msk [vmem:[#allocation3 + $0x10] sm:$0xff] %vm234_vm1, %v329_v35  ;;  %v743_v38 = vpop.f32.mrb[4].mxu1 }
 0x131   :  { %v221_v37 = vadd.f32 %v727_v36, %v665_v18  ;;  %v215_v39 = vpop.f32.mrb[5].mxu0  ;;  %v344_v40 = vadd.f32 %v743_v38, %v674_v19  ;;  %v338_v42 = vpop.f32.mrb[5].mxu1 }
 0x132   :  { %v216_v41 = vadd.f32 %v665_v18, %v215_v39  ;;  %v339_v43 = vadd.f32 %v674_v19, %v338_v42 }
 0x133   :  { %240 = vst.msk [vmem:[#allocation2 + $0x28] sm:$0xff] %vm234_vm1, %v221_v37  ;;  %362 = vst.msk [vmem:[#allocation3 + $0x28] sm:$0xff] %vm234_vm1, %v344_v40 }
 0x134   :  { %239 = vst.msk [vmem:[#allocation2 + $0x20] sm:$0xff] %vm234_vm1, %v216_v41  ;;  %v730_v44 = vpop.f32.mrb[6].mxu0  ;;  %361 = vst.msk [vmem:[#allocation3 + $0x20] sm:$0xff] %vm234_vm1, %v339_v43  ;;  %v746_v46 = vpop.f32.mrb[6].mxu1 }
 0x135   :  { %v231_v45 = vadd.f32 %v730_v44, %v665_v18  ;;  %v225_v47 = vpop.f32.mrb[7].mxu0  ;;  %v354_v48 = vadd.f32 %v746_v46, %v674_v19  ;;  %v348_v50 = vpop.f32.mrb[7].mxu1 }
 0x136   :  { %v226_v49 = vadd.f32 %v665_v18, %v225_v47  ;;  %v349_v51 = vadd.f32 %v674_v19, %v348_v50 }
 0x137   :  { %242 = vst.msk [vmem:[#allocation2 + $0x38] sm:$0xff] %vm234_vm1, %v231_v45  ;;  %364 = vst.msk [vmem:[#allocation3 + $0x38] sm:$0xff] %vm234_vm1, %v354_v48 }
 0x138   :  { %241 = vst.msk [vmem:[#allocation2 + $0x30] sm:$0xff] %vm234_vm1, %v226_v49  ;;  %363 = vst.msk [vmem:[#allocation3 + $0x30] sm:$0xff] %vm234_vm1, %v349_v51 }
 0x139 LB: > { %v986_v54 = vmov 0.0   ;;  %vm987_vm2 = vmmov 0   ;;  %s988_s7 = smov 120   ;;  %vm387_vm3 = vcmask 64512   ;;  %s989_s0 = smov 112   ;;  %s978_s3 = sphi %s1171_s3, %s374_s3   ;;  %v974_v53 = vphi %v1169_v53, %v569_v53   ;;  %v970_v52 = vphi %v1167_v52, %v598_v52  }
 0x13a   : > { %747 = vmatprep.subr.mxu0 %v986_v54  ;;  %749 = vmatprep.mubr.msk.f32.mxu0 %vm987_vm2, %v986_v54  ;;  %s687_s16 = sshll.u32 %s978_s3, 3  ;;  %s377_s12 = ssub.s32 7, %s978_s3 }
 0x13b   : > { %385 = vrot.lane.b32.xlu0 %v974_v53, %s988_s7  ;;  %748 = vmatpush3.msra.mxu0 %v1109_v0  ;;  %s1194_s13 = sshll.u32 %s377_s12, 3  ;;  %s542_s15 = scalar_lea.vmem [#allocation2], %s687_s16 }
 0x13c   : > { %752 = vmatprep.subr.mxu1 %v986_v54  ;;  %754 = vmatprep.mubr.msk.f32.mxu1 %vm987_vm2, %v986_v54  ;;  %s571_s17 = scalar_lea.vmem [#allocation3], %s1194_s13  ;;  %s990_s18 = smov 16  }
 0x13d   : > { %753 = vmatpush3.msra.mxu1 %v1111_v1  ;;  %s603_s1 = scalar_lea.vmem [#allocation12], %s687_s16  ;;  %s609_s14 = scalar_lea.vmem [#allocation13], %s1194_s13 }
 0x13e   : > { %s374_s3 = sadd.s32 1, %s978_s3  }
 0x13f   : > { %467 = vrot.lane.b32.xlu0 %v970_v52, %s988_s7  ;;  %v543_v63 = vld [vmem:[%s542_s15] sm:$0xff]  ;;  %p371_p4 = scmp.ge.s32.totalorder %s374_s3, 8  }
 0x140   : > { %v572_v5 = vld [vmem:[%s571_s17] sm:$0xff]  ;;  %s991_s19 = smov (%p371_p4), [#allocation12]   ;;  %s992_s2 = smov (%p371_p4), [#allocation13]  }
 0x141   :  { %s616_s21 = sshll.u32 (%p371_p4), %s991_s19, 4  ;;  %s628_s20 = sshll.u32 (%p371_p4), %s992_s2, 4  ;;  %s617_s21 = int_to_ptr.vmem [resolvable:$true] %s616_s21  ;;  %s1217_s20 = int_to_ptr.vmem [resolvable:$true] %s628_s20 }
 0x142   :  { %s902_s23 = scalar_lea.vmem (%p371_p4), %s617_s21, 1024  ;;  %p907_p6 = scmp.lt.s32.totalorder (%p371_p4), %s617_s21, %s617_s21 }
 0x143   :  { %p903_p5 = scmp.ne.s32.totalorder (%p371_p4), %s617_s21, %s902_s23  ;;  %p908_p7 = scmp.lt.s32.totalorder (%p371_p4), %s902_s23, %s902_s23 }
 0x145   :  { %p909_p8 = por (%p371_p4), %p908_p7, %p907_p6 }
 0x147   :  { %p910_p9 = pnand (%p371_p4), %p909_p8, %p903_p5 }
 0x1ad   : > { %v386_v55 = vpop.permute.xlu0 %385 }
 0x1ae   : > { %750 = vmatmul.mubr.msk.f32.vlgmr.msra.gmra.mrb[0].mxu0 %vm387_vm3, %v386_v55 }
 0x1b1   : > { %v468_v56 = vpop.permute.xlu0 %467 }
 0x1b2   : > { %755 = vmatmul.mubr.msk.f32.vlgmr.msra.gmra.mrb[0].mxu1 %vm387_vm3, %v468_v56 }
 0x281   : > { %v456_v57 = vpop.f32.mrb[0].mxu0 }
 0x282   : > { %v457_v58 = vadd.f32 %v1116_v2, %v456_v57  ;;  %v751_v59 = vpop.f32.mrb[1].mxu0 }
 0x284   : > { %552 = vrot.lane.b32.xlu1 %v457_v58, %s989_s0  ;;  %v544_v4 = vadd.f32 %v543_v63, %v457_v58 }
 0x285   : > { %v537_v60 = vpop.f32.mrb[0].mxu1 }
 0x286   : > { %v538_v61 = vadd.f32 %v1121_v3, %v537_v60  ;;  %v756_v62 = vpop.f32.mrb[1].mxu1  ;;  %v688_v6 = vmul.f32 -1.442695, %v544_v4 }
 0x288   : > { %581 = vrot.lane.b32.xlu1 %v538_v61, %s989_s0  ;;  %v573_v7 = vadd.f32 %v572_v5, %v538_v61  ;;  %802 = vpow2.f32 %v688_v6 }
 0x28a   : > { %v690_v8 = vmul.f32 -1.442695, %v573_v7 }
 0x28c   : > { %804 = vpow2.f32 %v690_v8 }
 0x292   : > { %v803_v9 = vpop.eup %802 }
 0x293   : > { %v548_v10 = vadd.f32 1.0, %v803_v9 }
 0x295   : > { %806 = vrcp.f32 %v548_v10 }
 0x296   : > { %v805_v11 = vpop.eup %804 }
 0x297   : > { %v577_v12 = vadd.f32 1.0, %v805_v11 }
 0x299   : > { %808 = vrcp.f32 %v577_v12 }
 0x29f   : > { %v807_v13 = vpop.eup %806 }
 0x2a0   : > { %v562_v25 = vsub.f32 1.0, %v807_v13  ;;  %v568_v27 = vmul.f32 %v974_v53, %v807_v13 }
 0x2a3   : > { %v809_v16 = vpop.eup %808 }
 0x2a4   : > { %v591_v29 = vsub.f32 1.0, %v809_v16  ;;  %v597_v31 = vmul.f32 %v970_v52, %v809_v16 }
 0x2f6   : > { %v553_v14 = vpop.permute.xlu1 %552 }
 0x2f7   : > { %v555_v15 = vmul.f32 %v807_v13, %v553_v14 }
 0x2f9   : > { %557 = vrot.lane.b32.xlu0 %v555_v15, %s990_s18 }
 0x2fa   : > { %v582_v17 = vpop.permute.xlu1 %581 }
 0x2fb   : > { %v584_v18 = vmul.f32 %v809_v16, %v582_v17 }
 0x2fd   : > { %586 = vrot.lane.b32.xlu1 %v584_v18, %s990_s18 }
 0x36b   : > { %v558_v19 = vpop.permute.xlu0 %557 }
 0x36c   : > { %v560_v20 = vadd.f32 %v558_v19, %v543_v63 }
 0x36e   : > { %810 = vtanh.f32 %v560_v20 }
 0x36f   : > { %v587_v21 = vpop.permute.xlu1 %586 }
 0x370   : > { %v589_v22 = vadd.f32 %v587_v21, %v572_v5 }
 0x372   : > { %812 = vtanh.f32 %v589_v22 }
 0x378   : > { %v811_v23 = vpop.eup %810 }
 0x379   : > { %564 = vrot.lane.b32.xlu0 %v811_v23, %s988_s7 }
 0x37c   : > { %v813_v24 = vpop.eup %812 }
 0x37d   : > { %593 = vrot.lane.b32.xlu1 %v813_v24, %s988_s7 }
 0x3eb   : > { %v565_v26 = vpop.permute.xlu0 %564 }
 0x3ec   : > { %v567_v28 = vmul.f32 %v565_v26, %v562_v25 }
 0x3ee   : > { %v569_v53 = vadd.f32 %v568_v27, %v567_v28  }
 0x3ef   : > { %v594_v30 = vpop.permute.xlu1 %593 }
 0x3f0   : > { %v596_v32 = vmul.f32 %v594_v30, %v591_v29  ;;  %600 = vrot.lane.b32.xlu0 %v569_v53, %s988_s7 }
 0x3f2   : > { %v598_v52 = vadd.f32 %v597_v31, %v596_v32  }
 0x3f4   : > { %606 = vrot.lane.b32.xlu1 %v598_v52, %s988_s7 }
 0x461   :  { %373 = sbr.rel (!%p371_p4) target bundleno = 313 (0x139), region = 91 }
 0x462   : > { %v601_v33 = vpop.permute.xlu0 %600 }
 0x463   : > { %604 = vst.msk [vmem:[%s603_s1] sm:$0xff] %vm387_vm3, %v601_v33 }
 0x466   : > { %v607_v34 = vpop.permute.xlu1 %606 }
 0x467   : > { %610 = vst.msk [vmem:[%s609_s14] sm:$0xff] %vm387_vm3, %v607_v34 }
 0x468   :  { %913 = shalt.err (!%p910_p9)
}
 0x469   :  { %s914_s28 = scalar_lea.hbm %s1263_s9, 1024 }
 0x46a   :  { %p915_p10 = scmp.ne.s32.totalorder %s1263_s9, %s914_s28  ;;  %p918_p11 = scmp.lt.u32.totalorder %s914_s28, %s1263_s9 }
 0x46c   :  { %p920_p12 = pnand %p918_p11, %p915_p10 }
 0x46e   :  { %923 = shalt.err (!%p920_p12)
}
 0x46f   :  { %622 = dma.vmem_to_hbm [thread:$0]  %s617_s21, 1024, %s1263_s9, [#allocation6], %s982_s25, %s982_s25, %s983_s26  }
 0x470   :  { %s924_s8 = scalar_lea.vmem %s1217_s20, 1024  ;;  %p929_p0 = scmp.lt.s32.totalorder %s1217_s20, %s1217_s20 }
 0x471   :  { %p925_p13 = scmp.ne.s32.totalorder %s1217_s20, %s924_s8  ;;  %p930_p1 = scmp.lt.s32.totalorder %s924_s8, %s924_s8 }
 0x473   :  { %p931_p2 = por %p930_p1, %p929_p0 }
 0x475   :  { %p932_p3 = pnand %p931_p2, %p925_p13 }
 0x477   :  { %935 = shalt.err (!%p932_p3)
}
 0x478   :  { %s936_s7 = scalar_lea.hbm %s1264_s10, 1024 }
 0x479   :  { %p937_p4 = scmp.ne.s32.totalorder %s1264_s10, %s936_s7  ;;  %p940_p5 = scmp.lt.u32.totalorder %s936_s7, %s1264_s10 }
 0x47b   :  { %p942_p6 = pnand %p940_p5, %p937_p4 }
 0x47d   :  { %945 = shalt.err (!%p942_p6)
}
 0x47e   :  { %634 = dma.vmem_to_hbm [thread:$0]  %s1217_s20, 1024, %s1264_s10, [#allocation14], %s982_s25, %s982_s25, %s983_s26  }
 0x47f   :  { %964 = dma.done.wait [#allocation6], 1024  }
 0x480   :  { %965 = vsyncadd [#allocation6], 4294966272 }
 0x481   :  { %966 = dma.done.wait [#allocation14], 1024  }
 0x482   :  { %967 = vsyncadd [#allocation14], 4294966272 }
 0x483   :  { %641 = vsyncpa [#allocation5], 1 }
 0x484   :  { %642 = vsyncpa [#allocation8], 1 }
 0x485   :  { %643 = vsyncpa [#allocation11], 1 }
 0x486   :  { %644 = vsyncpa [#allocation6], 1 }
 0x487   :  { %645 = vsyncpa [#allocation14], 1 }

</bundles_post_ra>
